<compile_context>
chip_gen: v5e
topology: v5e:2x2
jax: 0.10.0
libtpu: 0.0.40
codegen_flags: <defaults>
</compile_context>

<pallas_src>
import functools

import jax
import jax.numpy as jnp
from jax.experimental import pallas as pl
from jax.experimental.pallas import tpu as pltpu


def _round_up(x, m):
    return ((x + m - 1) // m) * m


_MAX_TILE_B = 8192  # ~1 MiB f32 x-tile at n=32; grid-step overhead well amortized.


def _vmem_limit_bytes():
    """Chip-aware scoped-VMEM limit: ~3/4 of physical (48 MiB v7x, 96 MiB v5e/v6e)."""
    cap = 64 * 1024 * 1024  # conservative default = v7x physical
    try:
        info = pltpu.get_tpu_info()
        cap = int(getattr(info, "vmem_capacity_bytes", cap))
    except Exception:
        pass
    return max(min((cap * 3) // 4, 112 * 1024 * 1024), 32 * 1024 * 1024)


def _pick_tile_b(B, n, x_itemsize, vmem_budget):
    """Batch tile sized against the VMEM budget; lane-aligned when multi-tile."""
    b8 = _round_up(B, 8)
    # Per-row VMEM cost: double-buffered native-dtype x rows + f32 in-kernel
    # intermediates (upcast x and x*x); constant for t1/t2/out slack.
    per_row = 2 * n * x_itemsize + 2 * n * 4 + 64
    cap = max((vmem_budget * 3) // (5 * per_row), 8)
    cap = min(cap, _MAX_TILE_B)
    if b8 <= 256 and b8 <= cap:
        # Tiny batch: one tile covers it (block == full output, still a dense store).
        return b8
    # Lane-aligned tiles; cap at ceil(B/2) so >= 2 tiles exist for v7x's 2 TCs.
    tile = min(cap, _round_up(pl.cdiv(B, 2), 128))
    tile = max((tile // 128) * 128, 128)
    return tile


def fm_kernel(bias_ref, x_ref, rhs_ref, o_ref, *, k):
    # x arrives in its native dtype; upcast happens in VMEM/vregs (free vs. an
    # extra HBM pass in the wrapper).
    x = x_ref[...].astype(jnp.float32)                                   # (TB, n)
    vw = rhs_ref[:, : k + 1]                                             # [v | w]   (n, k+1)
    v2 = rhs_ref[:, k + 1 :]                                             # v*v       (n, k)
    t1 = jnp.dot(x, vw, preferred_element_type=jnp.float32)              # [x@v | x@w] (TB, k+1)
    t2 = jnp.dot(x * x, v2, preferred_element_type=jnp.float32)          # (x^2)@(v^2) (TB, k)
    c1 = t1[:, :k]                                                       # x @ v     (TB, k)
    lin = t1[:, k:]                                                      # x @ w     (TB, 1)
    diff = c1 * c1 - t2                                                  # (TB, k)
    # Fused 0.5 * sum_k(.) + column->row transpose on the MXU: (1,k) x (TB,k)^T,
    # plus a tiny K=1 matmul transposing the linear term. Result is a lane-dense
    # (1, TB) row -> unmasked full-lane store.
    half = jnp.full((1, k), 0.5, dtype=jnp.float32)
    one = jnp.ones((1, 1), dtype=jnp.float32)
    dn = (((1,), (1,)), ((), ()))                                        # contract feature axis
    row = (
        jax.lax.dot_general(half, diff, dn, preferred_element_type=jnp.float32)
        + jax.lax.dot_general(one, lin, dn, preferred_element_type=jnp.float32)
    )                                                                    # (1, TB)
    o_ref[...] = (row + bias_ref[0]).astype(o_ref.dtype)


@functools.partial(jax.jit, static_argnames=("tile_b", "vmem_limit"))
def _fm_pallas(x, w, b, w0, v, *, tile_b, vmem_limit):
    B, n = x.shape
    k = v.shape[1]
    grid_b = pl.cdiv(B, tile_b)        # no jnp.pad of x: last tile DMA is clipped
    b_pad = grid_b * tile_b            # only the tiny (1, b_pad) output is padded

    # Hoisted, loop-invariant weight prep (tiny): one merged VMEM-resident array.
    v32 = v.astype(jnp.float32)
    w32 = jnp.reshape(w, (n, 1)).astype(jnp.float32)
    rhs = jnp.concatenate([v32, w32, v32 * v32], axis=1)                 # (n, 2k+1)
    bias = (jnp.reshape(w0, ()) + jnp.reshape(b, ())).astype(jnp.float32).reshape(1)

    out_row = pl.pallas_call(
        functools.partial(fm_kernel, k=k),
        out_shape=jax.ShapeDtypeStruct((1, b_pad), jnp.float32),
        grid=(grid_b,),
        in_specs=[
            pl.BlockSpec(memory_space=pltpu.SMEM),            # fused scalar bias (w0 + b)
            pl.BlockSpec((tile_b, n), lambda i: (i, 0)),      # streamed x tile, native dtype
            pl.BlockSpec((n, 2 * k + 1), lambda i: (0, 0)),   # resident [v | w | v*v]
        ],
        out_specs=pl.BlockSpec((1, tile_b), lambda i: (0, i)),
        compiler_params=pltpu.CompilerParams(
            dimension_semantics=("parallel",),                # shard batch tiles across TCs
            vmem_limit_bytes=vmem_limit,
        ),
    )(bias, x, rhs)

    return out_row[0, :B].reshape(B, 1)


def fm_forward(x, w, b, w0, v, *, tile_b=None):
    """FM forward. x: (B, n); w: (n, 1); b: (1,); w0: (1,); v: (n, k)."""
    B, n = x.shape
    vmem_limit = _vmem_limit_bytes()
    if tile_b is None:
        tile_b = _pick_tile_b(B, n, jnp.dtype(x.dtype).itemsize, vmem_limit)
    return _fm_pallas(x, w, b, w0, v, tile_b=int(tile_b), vmem_limit=int(vmem_limit))


if __name__ == "__main__":
    def ref_fm(x, w, b, w0, v):
        xf = x.astype(jnp.float32)
        lin = xf @ w + b[0]
        c1 = xf @ v
        c2 = (xf * xf) @ (v * v)
        return w0[0] + lin + 0.5 * jnp.sum(c1 * c1 - c2, axis=1, keepdims=True)

    key = jax.random.PRNGKey(0)
    kx, kw0, kw, kb, kv, kx2 = jax.random.split(key, 6)

    n, k = 32, 16
    # Deterministic synthetic parameters (shapes match the PyTorch module __init__).
    w0 = jax.random.normal(kw0, (1,), dtype=jnp.float32)         # nn.Parameter(randn(1))
    w = jax.random.normal(kw, (n, 1), dtype=jnp.float32) * 0.1   # nn.Linear(n,1) weight (transposed)
    b = jax.random.normal(kb, (1,), dtype=jnp.float32) * 0.1     # nn.Linear(n,1) bias
    v = jax.random.normal(kv, (n, k), dtype=jnp.float32)         # nn.Parameter(randn(n,k))

    # Case 1: small batch, single-tile path.
    x = jax.random.normal(kx, (8, n), dtype=jnp.float32)
    out = jax.block_until_ready(fm_forward(x, w, b, w0, v))
    ref = ref_fm(x, w, b, w0, v)
    assert out.shape == (8, 1)
    assert jnp.allclose(out, ref, atol=1e-4, rtol=1e-4), float(jnp.max(jnp.abs(out - ref)))

    # Case 2: non-tile-divisible batch -> multi-tile grid + clipped boundary DMA
    # (exercises the "no jnp.pad on x" path).
    x2 = jax.random.normal(kx2, (300, n), dtype=jnp.float32)
    out2 = jax.block_until_ready(fm_forward(x2, w, b, w0, v, tile_b=128))
    ref2 = ref_fm(x2, w, b, w0, v)
    assert out2.shape == (300, 1)
    assert jnp.allclose(out2, ref2, atol=1e-4, rtol=1e-4), float(jnp.max(jnp.abs(out2 - ref2)))

    print("KERNEL_OK")
</pallas_src>

<mosaic_0001>
module attributes {stable_mosaic.version = 11 : i64} {
  func.func @fm_kernel(%arg0: i32, %arg1: memref<1xf32, #tpu.memory_space<smem>>, %arg2: memref<8x32xf32, #tpu.memory_space<vmem>>, %arg3: memref<32x33xf32, #tpu.memory_space<vmem>>, %arg4: memref<1x8xf32, #tpu.memory_space<vmem>>) attributes {dimension_semantics = [#tpu.dimension_semantics<parallel>], iteration_bounds = array<i64: 1>, scalar_prefetch = 0 : i64, scratch_operands = 0 : i64, tpu.core_type = #tpu.core_type<tc>, window_params = [{transform_indices = @transform_0, window_bounds = array<i64: 1>}, {transform_indices = @transform_1, window_bounds = array<i64: 8, 32>}, {pipeline_mode = #tpu.pipeline_mode<synchronous>, transform_indices = @transform_2, window_bounds = array<i64: 32, 33>}, {transform_indices = @transform_3, window_bounds = array<i64: 1, 8>}]} {
    %c0 = arith.constant 0 : index
    %c0_0 = arith.constant 0 : index
    %0 = vector.load %arg2[%c0, %c0_0] : memref<8x32xf32, #tpu.memory_space<vmem>>, vector<8x32xf32>
    %c0_1 = arith.constant 0 : index
    %c0_2 = arith.constant 0 : index
    %1 = vector.load %arg3[%c0_1, %c0_2] : memref<32x33xf32, #tpu.memory_space<vmem>>, vector<32x17xf32>
    %c0_3 = arith.constant 0 : index
    %c17 = arith.constant 17 : index
    %2 = vector.load %arg3[%c0_3, %c17] : memref<32x33xf32, #tpu.memory_space<vmem>>, vector<32x16xf32>
    %cst = arith.constant dense<0.000000e+00> : vector<8x17xf32>
    %3 = tpu.matmul %0, %1, %cst {dimension_numbers = #tpu.dot_dimension_numbers<[1], [0], [0], [1], [0, 0, 1, 1], [], []>} : vector<8x32xf32>, vector<32x17xf32>, vector<8x17xf32> -> vector<8x17xf32>
    %4 = arith.mulf %0, %0 : vector<8x32xf32>
    %cst_4 = arith.constant dense<0.000000e+00> : vector<8x16xf32>
    %5 = tpu.matmul %4, %2, %cst_4 {dimension_numbers = #tpu.dot_dimension_numbers<[1], [0], [0], [1], [0, 0, 1, 1], [], []>} : vector<8x32xf32>, vector<32x16xf32>, vector<8x16xf32> -> vector<8x16xf32>
    %6 = vector.extract_strided_slice %3 {offsets = [0, 0], sizes = [8, 16], strides = [1, 1]} : vector<8x17xf32> to vector<8x16xf32>
    %7 = vector.extract_strided_slice %3 {offsets = [0, 16], sizes = [8, 1], strides = [1, 1]} : vector<8x17xf32> to vector<8x1xf32>
    %8 = arith.mulf %6, %6 : vector<8x16xf32>
    %9 = arith.subf %8, %5 : vector<8x16xf32>
    %cst_5 = arith.constant 5.000000e-01 : f32
    %10 = vector.broadcast %cst_5 : f32 to vector<1x16xf32>
    %cst_6 = arith.constant 1.000000e+00 : f32
    %11 = vector.broadcast %cst_6 : f32 to vector<1x1xf32>
    %cst_7 = arith.constant dense<0.000000e+00> : vector<1x8xf32>
    %12 = tpu.matmul %10, %9, %cst_7 {dimension_numbers = #tpu.dot_dimension_numbers<[1], [1], [0], [0], [0, 0, 1, 0], [], []>} : vector<1x16xf32>, vector<8x16xf32>, vector<1x8xf32> -> vector<1x8xf32>
    %cst_8 = arith.constant dense<0.000000e+00> : vector<1x8xf32>
    %13 = tpu.matmul %11, %7, %cst_8 {dimension_numbers = #tpu.dot_dimension_numbers<[1], [1], [0], [0], [0, 0, 1, 0], [], []>} : vector<1x1xf32>, vector<8x1xf32>, vector<1x8xf32> -> vector<1x8xf32>
    %14 = arith.addf %12, %13 : vector<1x8xf32>
    %c0_9 = arith.constant 0 : index
    %15 = memref.load %arg1[%c0_9] : memref<1xf32, #tpu.memory_space<smem>>
    %16 = vector.broadcast %15 : f32 to vector<1x8xf32>
    %17 = arith.addf %14, %16 : vector<1x8xf32>
    %c0_10 = arith.constant 0 : index
    %c0_11 = arith.constant 0 : index
    %18 = vector.load %arg4[%c0_10, %c0_11] : memref<1x8xf32, #tpu.memory_space<vmem>>, vector<1x8xf32>
    tpu.vector_store %arg4[%c0_10, %c0_11], %17 {strides = array<i32>} : memref<1x8xf32, #tpu.memory_space<vmem>>, vector<1x8xf32>,
    return
  }
  func.func @transform_0(%arg0: i32) -> i32 {
    %c0_i32 = arith.constant 0 : i32
    %c0_i32_0 = arith.constant 0 : i32
    return %c0_i32 : i32
  }
  func.func @transform_1(%arg0: i32) -> (i32, i32) {
    %c0_i32 = arith.constant 0 : i32
    %c0_i32_0 = arith.constant 0 : i32
    return %arg0, %c0_i32 : i32, i32
  }
  func.func @transform_2(%arg0: i32) -> (i32, i32) {
    %c0_i32 = arith.constant 0 : i32
    %c0_i32_0 = arith.constant 0 : i32
    %c0_i32_1 = arith.constant 0 : i32
    return %c0_i32, %c0_i32_0 : i32, i32
  }
  func.func @transform_3(%arg0: i32) -> (i32, i32) {
    %c0_i32 = arith.constant 0 : i32
    %c0_i32_0 = arith.constant 0 : i32
    return %c0_i32, %arg0 : i32, i32
  }
}

</mosaic_0001>

<bundles_post_ra>
// kernel: mul.1
= control target key start
LH: loop header
LB: loop body
LE: loop exit
PB: predicated region body
PF: predicated region fallthrough
CT: control target
= control target key end

     0   :  { %3 = vsyncpa [#allocation1], 0  ;;  %s138_s0 = inlined_call_operand.hbm [shape: f32[32,16], index: 0, kind: input, shape index: {}, may-alias: {0,1}]   ;;  %s139_s1 = inlined_call_operand.hbm [shape: f32[32,16], index: 1, kind: input, shape index: {}, may-alias: {0,1}]   ;;  %s140_s2 = inlined_call_operand.vmem [shape: f32[32,16], index: 2, kind: output, shape index: {}]  }
   0x1   :  { %s7_s0 = sshll.u32 %s138_s0, 4  ;;  %s8_s0 = int_to_ptr.hbm [resolvable:$true] %s7_s0 }
   0x2   :  { %4 = vsyncpa [#allocation3], 0  ;;  %s107_s11 = smov [#allocation0]   ;;  %s18_s1 = sshll.u32 %s139_s1, 4  ;;  %s19_s1 = int_to_ptr.hbm [resolvable:$true] %s18_s1 }
   0x3   :  { %s9_s12 = sshll.u32 %s107_s11, 4  ;;  %s108_s15 = smov 128   ;;  %s10_s12 = int_to_ptr.vmem [resolvable:$true] %s9_s12 }
   0x4   :  { %s109_s16 = smov 8   ;;  %s110_s17 = smov [#allocation2]  }
   0x5   :  { %15 = dma.hbm_to_vmem [thread:$0]  %s8_s0, 256, %s10_s12, [#allocation1], %s108_s15, %s108_s15, %s109_s16  }
   0x6   :  { %s20_s18 = sshll.u32 %s110_s17, 4  ;;  %s21_s18 = int_to_ptr.vmem [resolvable:$true] %s20_s18 }
   0x7   :  { %26 = dma.hbm_to_vmem [thread:$0]  %s19_s1, 256, %s21_s18, [#allocation3], %s108_s15, %s108_s15, %s109_s16  }
   0x8   :  { %103 = dma.done.wait [#allocation1], 256  }
   0x9   :  { %104 = vsyncadd [#allocation1], 4294967040 }
   0xa   :  { %105 = dma.done.wait [#allocation3], 256  }
   0xb   :  { %106 = vsyncadd [#allocation3], 4294967040  ;;  %v31_v0 = vld [vmem:[#allocation0] sm:$0xff]  ;;  %v32_v1 = vld [vmem:[#allocation2] sm:$0xff] }
   0xc   :  { %v39_v2 = vld [vmem:[#allocation0 + $0x8] sm:$0xff]  ;;  %v35_v3 = vmul.f32 %v32_v1, %v31_v0  ;;  %v41_v4 = vld [vmem:[#allocation2 + $0x8] sm:$0xff] }
   0xd   :  { %v44_v5 = vmul.f32 %v41_v4, %v39_v2 }
   0xe   :  { %37 = vst [vmem:[%s140_s2] sm:$0xff] %v35_v3 }
   0xf   :  { %50 = vst [vmem:[%s140_s2 + $0x8] sm:$0xff] %v44_v5 }
  0x10   :  { %48 = vsyncpa [#allocation1], 1 }
  0x11   :  { %49 = vsyncpa [#allocation3], 1 }

// kernel: _fm_pallas.1
= control target key start
LH: loop header
LB: loop body
LE: loop exit
PB: predicated region body
PF: predicated region fallthrough
CT: control target
= control target key end

     0   :  { %s259_s0 = inlined_call_operand.<no memory space> [shape: f32[1], index: 0, kind: input, shape index: {}]   ;;  %s260_s1 = inlined_call_operand.vmem [shape: f32[8,32], index: 1, kind: input, shape index: {}]   ;;  %s261_s2 = inlined_call_operand.vmem [shape: f32[32,33], index: 2, kind: input, shape index: {}]   ;;  %s262_s3 = inlined_call_operand.hbm [shape: f32[1,8], index: 3, kind: output, shape index: {}]  }
   0x1   :  { %v19_v0 = vld [vmem:[%s261_s2 + $0x10] sm:$0xff]  ;;  %v20_v1 = vld [vmem:[%s261_s2 + $0x18] sm:$0xff] }
   0x2   :  { %v175_v2 = vpack.i.bf16 %v19_v0, %v20_v1  ;;  %37 = vmatpush.msra.mxu0 %v20_v1 }
   0x3   :  { %9 = vsyncpa [#allocation4], 0  ;;  %s211_s16 = smov 111   ;;  %v17_v3 = vld [vmem:[%s261_s2] sm:$0xff]  ;;  %v18_v4 = vld [vmem:[%s261_s2 + $0x8] sm:$0xff]  ;;  %vm21_vm0 = vcmask 261120   ;;  %v144_v23 = vstv %s259_s0 }
   0x4   :  { %176 = vrot.lane.b32.xlu0 %v175_v2, %s211_s16  ;;  %38 = vmatpush.msra.mxu0 %v19_v0  ;;  %v16_v5 = vld [vmem:[%s260_s1] sm:$0xff]  ;;  %v180_v6 = vpack.i.bf16 %v17_v3, %v18_v4  ;;  %s212_s1 = smov 112   ;;  %vm90_vm1 = vcmask 7168   ;;  %v213_v16 = vmov 1.0   ;;  %vm116_vm2 = vcmask 130048   ;;  %s215_s24 = smov [#allocation3]  }
   0x5   :  { %v45_v12 = vmul.f32 %v16_v5, %v16_v5  ;;  %v214_v20 = vmov 0.5   ;;  %s153_s25 = sshll.u32 %s215_s24, 4  ;;  %s155_s28 = sshll.u32 %s262_s3, 4  ;;  %vm146_vm3 = vcmask 57344   ;;  %s154_s25 = int_to_ptr.vmem [resolvable:$true] %s153_s25  ;;  %s156_s28 = int_to_ptr.hbm [resolvable:$true] %s155_s28 }
   0x6   :  { %39 = vmatpush.msra.mxu0 %v18_v4 }
   0x8   :  { %40 = vmatpush.msra.mxu0 %v17_v3 }
   0x9   :  { %164 = vmatmul.msk.f32.vlgmr.msra.gmra.mxu0 %vm21_vm0, %v16_v5 }
   0xc   :  { %181 = vrot.lane.b32.xlu0 %v180_v6, %s211_s16 }
  0x76   :  { %v177_v7 = vpop.permute.xlu0 %176 }
  0x77   :  { %v178_v8 = vunpack.i.l.bf16 %v177_v7  ;;  %v179_v9 = vunpack.i.h.bf16 %v177_v7 }
  0x79   :  { %77 = vmatpush.msra.mxu1 %v178_v8 }
  0x7b   :  { %78 = vmatpush.msra.mxu1 %v179_v9 }
  0x7e   :  { %v182_v10 = vpop.permute.xlu0 %181 }
  0x7f   :  { %v183_v11 = vunpack.i.l.bf16 %v182_v10  ;;  %v184_v13 = vunpack.i.h.bf16 %v182_v10 }
  0x81   :  { %79 = vmatpush.msra.mxu1 %v183_v11 }
  0x83   :  { %80 = vmatpush.msra.mxu1 %v184_v13 }
  0x84   :  { %165 = vmatmul.msk.f32.vlgmr.msra.gmra.mxu1 %vm21_vm0, %v45_v12 }
  0x86   :  { %v42_v14 = vpop.f32.mrf.mxu0 }
  0x87   :  { %88 = vrot.lane.b32.xlu1 %v42_v14, %s212_s1  ;;  %v85_v17 = vmul.f32 %v42_v14, %v42_v14 }
  0xf9   :  { %v89_v15 = vpop.permute.xlu1 %88 }
  0xfa   :  { %166 = vmatpush.xpose.msk.msra.mxu2 %vm90_vm1, %v89_v15 }
  0xfd   :  { %167 = vmatmul.msk.f32.vlgmr.msra.gmra.mxu2 %vm90_vm1, %v213_v16 }
 0x101   :  { %v82_v18 = vpop.f32.mrf.mxu1 }
 0x102   :  { %v86_v19 = vsub.f32 %v85_v17, %v82_v18 }
 0x104   :  { %168 = vmatpush.xpose.msk.msra.mxu3 %vm116_vm2, %v86_v19 }
 0x107   :  { %169 = vmatmul.msk.f32.vlgmr.msra.gmra.mxu3 %vm116_vm2, %v214_v20 }
 0x180   :  { %v113_v21 = vpop.f32.mrf.mxu2 }
 0x18a   :  { %v140_v22 = vpop.f32.mrf.mxu3 }
 0x18b   :  { %v141_v24 = vadd.f32 %v140_v22, %v113_v21 }
 0x18d   :  { %v145_v25 = vadd.f32 %v144_v23, %v141_v24 }
 0x18f   :  { %147 = vst.msk [vmem:[#allocation3] sm:$0x1] %vm146_vm3, %v145_v25 }
 0x190   :  { %158 = dma.vmem_to_hbm [thread:$0]  %s154_s25, 16, %s156_s28, [#allocation4]  }
 0x191   :  { %209 = dma.done.wait [#allocation4], 16  }
 0x192   :  { %210 = vsyncadd [#allocation4], 4294967280 }
 0x193   :  { %163 = vsyncpa [#allocation4], 1 }

</bundles_post_ra>
